<compile_context>
chip_gen: v7x
topology: tpu7x:2x2x1
jax: 0.10.0
libtpu: 0.0.40
codegen_flags: <defaults>
</compile_context>

<pallas_src>
import jax
import jax.numpy as jnp
from jax.experimental import pallas as pl
from jax.experimental.pallas import tpu as pltpu


_MAX_MXU_IN_W = 128        # max packed input lane width for the matmul path
_TARGET_OUT_LANES = 512    # desired output block lane width (multiple of 128)


# ---------------------------------------------------------------------------
# Kernels
# ---------------------------------------------------------------------------

def _cat_repeat_matmul_kernel(w_ref, b_ref, o_ref):
    """out_row = packed_w_row @ B (B encodes cat + repeat_interleave + adds).

    One MXU matmul (the MXU is otherwise idle in this memory-bound kernel) and
    one lane-dense store; no lane-width-2 intermediates, no tile-crossing
    reshapes, no misaligned column stores.
    """
    o_ref[...] = jnp.dot(
        w_ref[...], b_ref[...], preferred_element_type=jnp.float32
    ).astype(o_ref.dtype)


def _cat_repeat_vpu_kernel(w_ref, o_ref):
    """Wide-N path (N > 128): pure VPU adds + one x2 lane upsample per half.

    half_a / half_b are built directly from the two N//2-wide slabs of 2*w, so
    the 2N-wide repeat_interleave result is never materialized nor sliced at a
    lane-misaligned offset (review fix "a").
    """
    tm, n = w_ref.shape
    w = w_ref[...]
    ww = w + w                                   # 2*w — unique content of xy
    if n % 2 == 0:
        h = n // 2
        rep_lo = jnp.broadcast_to(ww[:, :h, None], (tm, h, 2)).reshape(tm, n)
        rep_hi = jnp.broadcast_to(ww[:, h:, None], (tm, h, 2)).reshape(tm, n)
    else:
        # TODO(synk): odd N > 128 keeps the full-width interleave (rare shape).
        rep = jnp.broadcast_to(ww[:, :, None], (tm, n, 2)).reshape(tm, 2 * n)
        rep_lo, rep_hi = rep[:, :n], rep[:, n:]
    half_a = rep_lo + w          # out columns [0,  N) and [2N, 3N)
    half_b = rep_hi + w          # out columns [N, 2N) and [3N, 4N)
    o_ref[:, 0 * n:1 * n] = half_a
    o_ref[:, 1 * n:2 * n] = half_b
    o_ref[:, 2 * n:3 * n] = half_a
    o_ref[:, 3 * n:4 * n] = half_b


# ---------------------------------------------------------------------------
# Generation-aware tiling helpers
# ---------------------------------------------------------------------------

def _tpu_generation():
    try:
        kind = jax.devices()[0].device_kind.lower()
    except Exception:
        return "other"
    if "v7" in kind or "7x" in kind:
        return "v7x"
    if "v6" in kind:
        return "v6e"
    if "v5" in kind and ("lite" in kind or "5e" in kind):
        return "v5e"
    return "other"


# (block+temp VMEM budget, max rows per tile, explicit vmem_limit_bytes, TCs)
_GEN_CFG = {
    "v7x":   (20 << 20, 1024, 30 << 20, 2),   # 64 MiB physical VMEM, 2 TCs
    "v6e":   (28 << 20, 2048, 64 << 20, 1),   # 128 MiB physical VMEM
    "v5e":   (12 << 20, 512,  None,     1),   # 16 MiB default scoped VMEM
    "other": (12 << 20, 512,  None,     1),
}


def _choose_tm(m_rows, words_per_row, fixed_bytes, itemsize, gen):
    """Biggest sublane-aligned row tile that fits the per-generation budget.

    `words_per_row` must already include double-buffered in/out blocks AND the
    in-kernel intermediates (review: under-counting temps causes spills once
    the budget is raised)."""
    budget, row_cap, _, n_cores = _GEN_CFG[gen]
    sub = {4: 8, 2: 16, 1: 32}.get(itemsize, 8)   # dtype-aware sublane rounding
    bytes_per_row = words_per_row * itemsize
    avail = max(budget - fixed_bytes, sub * bytes_per_row)
    cap = max(sub, min(row_cap, (avail // bytes_per_row) // sub * sub))
    # Guarantee >= 2 grid steps on multi-TensorCore parts (v7x) so the
    # "parallel" row axis shards across both cores.
    if n_cores > 1 and m_rows >= 2 * sub:
        per_core = -(-m_rows // n_cores)          # cdiv
        per_core = -(-per_core // sub) * sub      # round up to sublane multiple
        cap = min(cap, per_core)
    tm = min(cap, m_rows)
    if tm < m_rows:                               # partial tiling: keep aligned
        tm = max(sub, (tm // sub) * sub)
    return tm


def _choose_pack_factor(m_rows, n):
    """Pack k consecutive logical rows per kernel row (free contiguous reshape)
    so the output block is lane-dense, while the constant matrix (kN, 4kN) and
    MXU work stay small enough to remain memory-bound on every generation."""
    best = 1
    k_hi = min(m_rows, max(1, _MAX_MXU_IN_W // max(n, 1)))
    for k in range(1, k_hi + 1):
        if m_rows % k:
            continue
        lanes = 4 * n * k
        if lanes >= _TARGET_OUT_LANES and lanes % 128 == 0:
            return k
        best = k
    return best


def _build_cat_repeat_matrix(n, k, dtype):
    """B[(s*N + t), (s*4N + c)] = 2*[t == (c//2) % N] + [t == c % N]."""
    kn = k * n
    i = jnp.arange(kn)[:, None]
    j = jnp.arange(4 * kn)[None, :]
    seg_i, t = i // n, i % n
    seg_j, c = j // (4 * n), j % (4 * n)
    same = seg_i == seg_j
    b = (2.0 * jnp.where(same & (t == (c // 2) % n), 1.0, 0.0)
         + jnp.where(same & (t == c % n), 1.0, 0.0))
    return b.astype(dtype)


# ---------------------------------------------------------------------------
# Wrapper
# ---------------------------------------------------------------------------

def _reference(w):
    """Pure-JAX mirror of the PyTorch forward (also the tiny-input fallback)."""
    x = jnp.concatenate([w, w], axis=2)
    y = jnp.concatenate([w, w], axis=2)
    xy = x + y
    z = jnp.concatenate([x, y], axis=2)
    repeat_xy = jnp.repeat(xy, 2, axis=2)
    return repeat_xy + z


def not_merged_consecutive_cat_net1(w, *, force_pallas=False):
    """w: (B, C, N) -> (B, C, 4N), matching NotMergedConsecutiveCatNet1."""
    batch, chan, n = w.shape
    m = batch * chan
    dtype = w.dtype
    itemsize = jnp.dtype(dtype).itemsize

    # Tiny inputs: pallas_call fixed overhead (~us) + narrow masked stores
    # would dominate; let XLA handle them unless the Pallas path is forced.
    if not force_pallas and m * 4 * n * itemsize < (1 << 20):
        return _reference(w)

    gen = _tpu_generation()
    vmem_limit = _GEN_CFG[gen][2]
    cparams = {"dimension_semantics": ("parallel",)}
    if vmem_limit is not None:
        cparams["vmem_limit_bytes"] = vmem_limit

    w2 = w.reshape(m, n)

    if n <= _MAX_MXU_IN_W:
        # --- MXU path: out_row = packed_w_row @ B, single lane-dense store. ---
        k = _choose_pack_factor(m, n)
        mp, in_w, out_w = m // k, k * n, 4 * k * n
        b_mat = _build_cat_repeat_matrix(n, k, dtype)
        fixed = 2 * in_w * out_w * itemsize               # double-buffered B
        tm = _choose_tm(mp, 3 * (in_w + out_w), fixed, itemsize, gen)
        cost = pl.CostEstimate(
            flops=2 * mp * in_w * out_w,
            transcendentals=0,
            bytes_accessed=(mp * in_w + mp * out_w + in_w * out_w) * itemsize,
        )
        out2 = pl.pallas_call(
            _cat_repeat_matmul_kernel,
            out_shape=jax.ShapeDtypeStruct((mp, out_w), dtype),
            grid=(pl.cdiv(mp, tm),),
            in_specs=[
                pl.BlockSpec((tm, in_w), lambda i: (i, 0)),
                pl.BlockSpec((in_w, out_w), lambda i: (0, 0)),  # resident const
            ],
            out_specs=pl.BlockSpec((tm, out_w), lambda i: (i, 0)),
            compiler_params=pltpu.CompilerParams(**cparams),
            cost_estimate=cost,
        )(w2.reshape(mp, in_w), b_mat)
        return out2.reshape(batch, chan, 4 * n)

    # --- VPU path (N > 128): halves built directly from the N//2 slabs. ---
    in_w, out_w = n, 4 * n
    tm = _choose_tm(m, 10 * in_w + 2 * out_w, 0, itemsize, gen)
    cost = pl.CostEstimate(
        flops=6 * m * n,
        transcendentals=0,
        bytes_accessed=(m * in_w + m * out_w) * itemsize,
    )
    out2 = pl.pallas_call(
        _cat_repeat_vpu_kernel,
        out_shape=jax.ShapeDtypeStruct((m, out_w), dtype),
        grid=(pl.cdiv(m, tm),),
        in_specs=[pl.BlockSpec((tm, in_w), lambda i: (i, 0))],
        out_specs=pl.BlockSpec((tm, out_w), lambda i: (i, 0)),
        compiler_params=pltpu.CompilerParams(**cparams),
        cost_estimate=cost,
    )(w2)
    return out2.reshape(batch, chan, 4 * n)


if __name__ == "__main__":
    k0, k1, k2 = jax.random.split(jax.random.PRNGKey(0), 3)

    # Small shape consistent with the module's (batch, channels, seq) input.
    # Exercises the packed MXU path (k=4 -> (8,128) @ (128,512), 512-lane store).
    w_small = jax.random.normal(k0, (4, 8, 32), dtype=jnp.float32)
    out_small = jax.block_until_ready(
        not_merged_consecutive_cat_net1(w_small, force_pallas=True))
    assert out_small.shape == (4, 8, 128), out_small.shape
    assert jnp.allclose(out_small, _reference(w_small), atol=1e-5, rtol=1e-5)

    # Wide-N shape exercising the VPU (review fix "a") kernel path.
    w_wide = jax.random.normal(k1, (2, 4, 256), dtype=jnp.float32)
    out_wide = jax.block_until_ready(
        not_merged_consecutive_cat_net1(w_wide, force_pallas=True))
    assert out_wide.shape == (2, 4, 1024), out_wide.shape
    assert jnp.allclose(out_wide, _reference(w_wide), atol=1e-5, rtol=1e-5)

    # The module's own example shape goes through the tiny-input XLA fallback.
    w_tiny = jax.random.normal(k2, (1, 2, 3), dtype=jnp.float32)
    out_tiny = jax.block_until_ready(not_merged_consecutive_cat_net1(w_tiny))
    assert out_tiny.shape == (1, 2, 12), out_tiny.shape
    assert jnp.allclose(out_tiny, _reference(w_tiny), atol=1e-5, rtol=1e-5)

    print("KERNEL_OK")
</pallas_src>

<mosaic_0001>
module attributes {stable_mosaic.version = 11 : i64} {
  func.func @_cat_repeat_matmul_kernel(%arg0: i32, %arg1: memref<8x128xf32, #tpu.memory_space<vmem>>, %arg2: memref<128x512xf32, #tpu.memory_space<vmem>>, %arg3: memref<8x512xf32, #tpu.memory_space<vmem>>) attributes {dimension_semantics = [#tpu.dimension_semantics<parallel>], iteration_bounds = array<i64: 1>, scalar_prefetch = 0 : i64, scratch_operands = 0 : i64, tpu.core_type = #tpu.core_type<tc>, window_params = [{transform_indices = @transform_0, window_bounds = array<i64: 8, 128>}, {pipeline_mode = #tpu.pipeline_mode<synchronous>, transform_indices = @transform_1, window_bounds = array<i64: 128, 512>}, {transform_indices = @transform_2, window_bounds = array<i64: 8, 512>}]} {
    %c0 = arith.constant 0 : index
    %c0_0 = arith.constant 0 : index
    %0 = vector.load %arg1[%c0, %c0_0] : memref<8x128xf32, #tpu.memory_space<vmem>>, vector<8x128xf32>
    %c0_1 = arith.constant 0 : index
    %c0_2 = arith.constant 0 : index
    %1 = vector.load %arg2[%c0_1, %c0_2] : memref<128x512xf32, #tpu.memory_space<vmem>>, vector<128x512xf32>
    %cst = arith.constant dense<0.000000e+00> : vector<8x512xf32>
    %2 = tpu.matmul %0, %1, %cst {dimension_numbers = #tpu.dot_dimension_numbers<[1], [0], [0], [1], [0, 0, 1, 1], [], []>} : vector<8x128xf32>, vector<128x512xf32>, vector<8x512xf32> -> vector<8x512xf32>
    %c0_3 = arith.constant 0 : index
    %c0_4 = arith.constant 0 : index
    %3 = vector.load %arg3[%c0_3, %c0_4] : memref<8x512xf32, #tpu.memory_space<vmem>>, vector<8x512xf32>
    tpu.vector_store %arg3[%c0_3, %c0_4], %2 {strides = array<i32>} : memref<8x512xf32, #tpu.memory_space<vmem>>, vector<8x512xf32>,
    return
  }
  func.func @transform_0(%arg0: i32) -> (i32, i32) {
    %c0_i32 = arith.constant 0 : i32
    %c0_i32_0 = arith.constant 0 : i32
    return %arg0, %c0_i32 : i32, i32
  }
  func.func @transform_1(%arg0: i32) -> (i32, i32) {
    %c0_i32 = arith.constant 0 : i32
    %c0_i32_0 = arith.constant 0 : i32
    %c0_i32_1 = arith.constant 0 : i32
    return %c0_i32, %c0_i32_0 : i32, i32
  }
  func.func @transform_2(%arg0: i32) -> (i32, i32) {
    %c0_i32 = arith.constant 0 : i32
    %c0_i32_0 = arith.constant 0 : i32
    return %arg0, %c0_i32 : i32, i32
  }
}

</mosaic_0001>

<bundles_post_ra>
// kernel: tpu_custom_call.1
= control target key start
LH: loop header
LB: loop body
LE: loop exit
PB: predicated region body
PF: predicated region fallthrough
CT: control target
= control target key end

     0   :  { %7 = vsyncpa [#allocation3], 0  ;;  %s471_s0 = inlined_call_operand.hbm [shape: f32[8,128], index: 0, kind: input, shape index: {}]   ;;  %s472_s1 = inlined_call_operand.hbm [shape: f32[128,512], index: 1, kind: input, shape index: {}]   ;;  %s473_s2 = inlined_call_operand.hbm [shape: f32[8,512], index: 2, kind: output, shape index: {}]  }
   0x1   :  { %8 = vsyncpa [#allocation6], 0 }
   0x2   :  { %9 = vsyncpa [#allocation4], 0  ;;  %s407_s9 = smov [#allocation2]   ;;  %s408_s11 = smov [#allocation5]  }
   0x3   :  { %s16_s10 = sshll.u32 %s407_s9, 4  ;;  %s25_s12 = sshll.u32 %s408_s11, 4  ;;  %s17_s10 = int_to_ptr.vmem [resolvable:$true] %s16_s10  ;;  %s428_s12 = int_to_ptr.vmem [resolvable:$true] %s25_s12 }
   0x4   :  { %s335_s15 = scalar_lea.hbm %s471_s0, 128 }
   0x5   :  { %p336_p0 = scmp.ne.s32.totalorder %s471_s0, %s335_s15  ;;  %p339_p1 = scmp.lt.u32.totalorder %s335_s15, %s471_s0 }
   0x7   :  { %p341_p2 = pnand %p339_p1, %p336_p0 }
   0x9   :  { %344 = shalt.err (!%p341_p2)
}
   0xa   :  { %s345_s20 = scalar_lea.vmem %s17_s10, 128  ;;  %p350_p4 = scmp.lt.s32.totalorder %s17_s10, %s17_s10 }
   0xb   :  { %p346_p3 = scmp.ne.s32.totalorder %s17_s10, %s345_s20  ;;  %p351_p5 = scmp.lt.s32.totalorder %s345_s20, %s345_s20 }
   0xd   :  { %p352_p6 = por %p351_p5, %p350_p4 }
   0xf   :  { %p353_p7 = pnand %p352_p6, %p346_p3 }
  0x11   :  { %356 = shalt.err (!%p353_p7)
}
  0x12   :  { %19 = dma.hbm_to_vmem [thread:$0]  %s471_s0, 128, %s17_s10, [#allocation3]  }
  0x13   :  { %s357_s25 = scalar_lea.hbm %s472_s1, 8192 }
  0x14   :  { %p358_p8 = scmp.ne.s32.totalorder %s472_s1, %s357_s25  ;;  %p361_p9 = scmp.lt.u32.totalorder %s357_s25, %s472_s1 }
  0x16   :  { %p363_p10 = pnand %p361_p9, %p358_p8 }
  0x18   :  { %366 = shalt.err (!%p363_p10)
}
  0x19   :  { %s367_s30 = scalar_lea.vmem %s428_s12, 8192  ;;  %p372_p12 = scmp.lt.s32.totalorder %s428_s12, %s428_s12 }
  0x1a   :  { %p368_p11 = scmp.ne.s32.totalorder %s428_s12, %s367_s30  ;;  %p373_p13 = scmp.lt.s32.totalorder %s367_s30, %s367_s30 }
  0x1c   :  { %p374_p0 = por %p373_p13, %p372_p12 }
  0x1e   :  { %p375_p1 = pnand %p374_p0, %p368_p11 }
  0x20   :  { %378 = shalt.err (!%p375_p1)
}
  0x21   :  { %s409_s0 = smov 512   ;;  %s410_s3 = smov 32  }
  0x22   :  { %31 = dma.hbm_to_vmem [thread:$0]  %s472_s1, 8192, %s428_s12, [#allocation6], %s409_s0, %s409_s0, %s410_s3  }
  0x23   :  { %401 = dma.done.wait [#allocation3], 128  }
  0x24   :  { %402 = vsyncadd [#allocation3], 4294967168 }
  0x25   :  { %403 = dma.done.wait [#allocation6], 8192  }
  0x26   :  { %404 = vsyncadd [#allocation6], 4294959104  ;;  %v411_v0 = vmov 0.0   ;;  %v40_v1 = vld [vmem:[#allocation5 + $0x8] sm:$0xff]  ;;  %v42_v3 = vld [vmem:[#allocation5 + $0x18] sm:$0xff]  ;;  %s412_s1 = smov [#allocation7]  }
  0x27   :  { %167 = vmatprep.mubr.f32.mxu0 %v411_v0  ;;  %238 = vmatprep.mubr.f32.mxu1 %v411_v0  ;;  %v44_v2 = vld [vmem:[#allocation5 + $0x28] sm:$0xff]  ;;  %v46_v5 = vld [vmem:[#allocation5 + $0x38] sm:$0xff]  ;;  %v39_v6 = vld [vmem:[#allocation5] sm:$0xff]  ;;  %s255_s6 = sshll.u32 %s412_s1, 4  ;;  %s256_s6 = int_to_ptr.vmem [resolvable:$true] %s255_s6 }
  0x28   :  { %v265_v4 = vpack.c.bf16 %v44_v2, %v40_v1  ;;  %v43_v7 = vld [vmem:[#allocation5 + $0x20] sm:$0xff]  ;;  %v297_v8 = vpack.c.bf16 %v46_v5, %v42_v3  ;;  %v41_v10 = vld [vmem:[#allocation5 + $0x10] sm:$0xff]  ;;  %v48_v12 = vld [vmem:[#allocation5 + $0x48] sm:$0xff]  ;;  %s379_s7 = scalar_lea.vmem %s256_s6, 512  ;;  %p384_p3 = scmp.lt.s32.totalorder %s256_s6, %s256_s6 }
  0x29   :  { %v267_v9 = vpack.c.bf16 %v43_v7, %v39_v6  ;;  %v45_v11 = vld [vmem:[#allocation5 + $0x30] sm:$0xff]  ;;  %v52_v14 = vld [vmem:[#allocation5 + $0x68] sm:$0xff]  ;;  %v50_v15 = vld [vmem:[#allocation5 + $0x58] sm:$0xff]  ;;  %p380_p2 = scmp.ne.s32.totalorder %s256_s6, %s379_s7  ;;  %p385_p4 = scmp.lt.s32.totalorder %s379_s7, %s379_s7 }
  0x2a   :  { %266 = vmatprep.subr.bf16.mxu0 %v265_v4  ;;  %v299_v13 = vpack.c.bf16 %v45_v11, %v41_v10  ;;  %v54_v16 = vld [vmem:[#allocation5 + $0x78] sm:$0xff]  ;;  %298 = vmatprep.subr.bf16.mxu1 %v297_v8  ;;  %v269_v17 = vpack.c.bf16 %v52_v14, %v48_v12  ;;  %v47_v19 = vld [vmem:[#allocation5 + $0x40] sm:$0xff]  ;;  %v49_v21 = vld [vmem:[#allocation5 + $0x50] sm:$0xff] }
  0x2b   :  { %268 = vmatpush1.bf16.msra.mxu0 %v267_v9  ;;  %v301_v18 = vpack.c.bf16 %v54_v16, %v50_v15  ;;  %v51_v20 = vld [vmem:[#allocation5 + $0x60] sm:$0xff]  ;;  %v53_v23 = vld [vmem:[#allocation5 + $0x70] sm:$0xff]  ;;  %v56_v24 = vld [vmem:[#allocation5 + $0x88] sm:$0xff]  ;;  %p386_p5 = por %p385_p4, %p384_p3 }
  0x2c   :  { %300 = vmatpush1.bf16.msra.mxu1 %v299_v13  ;;  %v271_v22 = vpack.c.bf16 %v51_v20, %v47_v19  ;;  %v60_v25 = vld [vmem:[#allocation5 + $0xa8] sm:$0xff]  ;;  %270 = vmatprep.subr.bf16.mxu0 %v269_v17  ;;  %v303_v26 = vpack.c.bf16 %v53_v23, %v49_v21  ;;  %v58_v28 = vld [vmem:[#allocation5 + $0x98] sm:$0xff]  ;;  %v55_v30 = vld [vmem:[#allocation5 + $0x80] sm:$0xff] }
  0x2d   :  { %302 = vmatprep.subr.bf16.mxu1 %v301_v18  ;;  %v273_v27 = vpack.c.bf16 %v60_v25, %v56_v24  ;;  %v62_v29 = vld [vmem:[#allocation5 + $0xb8] sm:$0xff]  ;;  %v59_v32 = vld [vmem:[#allocation5 + $0xa0] sm:$0xff]  ;;  %v57_v33 = vld [vmem:[#allocation5 + $0x90] sm:$0xff]  ;;  %p387_p6 = pnand %p386_p5, %p380_p2 }
  0x2e   :  { %v305_v31 = vpack.c.bf16 %v62_v29, %v58_v28  ;;  %v61_v34 = vld [vmem:[#allocation5 + $0xb0] sm:$0xff]  ;;  %v275_v35 = vpack.c.bf16 %v59_v32, %v55_v30  ;;  %v64_v36 = vld [vmem:[#allocation5 + $0xc8] sm:$0xff]  ;;  %v66_v38 = vld [vmem:[#allocation5 + $0xd8] sm:$0xff] }
  0x2f   :  { %272 = vmatpush1.bf16.msra.mxu0 %v271_v22  ;;  %v68_v37 = vld [vmem:[#allocation5 + $0xe8] sm:$0xff]  ;;  %v307_v39 = vpack.c.bf16 %v61_v34, %v57_v33  ;;  %v70_v41 = vld [vmem:[#allocation5 + $0xf8] sm:$0xff]  ;;  %v63_v42 = vld [vmem:[#allocation5 + $0xc0] sm:$0xff] }
  0x30   :  { %304 = vmatpush1.bf16.msra.mxu1 %v303_v26  ;;  %274 = vmatprep.subr.bf16.mxu0 %v273_v27  ;;  %v277_v40 = vpack.c.bf16 %v68_v37, %v64_v36  ;;  %v67_v43 = vld [vmem:[#allocation5 + $0xe0] sm:$0xff]  ;;  %v309_v44 = vpack.c.bf16 %v70_v41, %v66_v38  ;;  %v65_v45 = vld [vmem:[#allocation5 + $0xd0] sm:$0xff]  ;;  %v72_v47 = vld [vmem:[#allocation5 + $0x108] sm:$0xff] }
  0x31   :  { %306 = vmatprep.subr.bf16.mxu1 %v305_v31  ;;  %v69_v46 = vld [vmem:[#allocation5 + $0xf0] sm:$0xff]  ;;  %v76_v48 = vld [vmem:[#allocation5 + $0x128] sm:$0xff]  ;;  %v74_v49 = vld [vmem:[#allocation5 + $0x118] sm:$0xff]  ;;  %v279_v51 = vpack.c.bf16 %v67_v43, %v63_v42 }
  0x32   :  { %v78_v50 = vld [vmem:[#allocation5 + $0x138] sm:$0xff]  ;;  %v311_v52 = vpack.c.bf16 %v69_v46, %v65_v45  ;;  %v281_v53 = vpack.c.bf16 %v76_v48, %v72_v47  ;;  %v71_v54 = vld [vmem:[#allocation5 + $0x100] sm:$0xff]  ;;  %v73_v56 = vld [vmem:[#allocation5 + $0x110] sm:$0xff] }
  0x33   :  { %276 = vmatpush1.bf16.msra.mxu0 %v275_v35  ;;  %v75_v55 = vld [vmem:[#allocation5 + $0x120] sm:$0xff]  ;;  %v313_v57 = vpack.c.bf16 %v78_v50, %v74_v49  ;;  %v77_v58 = vld [vmem:[#allocation5 + $0x130] sm:$0xff]  ;;  %v80_v59 = vld [vmem:[#allocation5 + $0x148] sm:$0xff] }
  0x34   :  { %308 = vmatpush1.bf16.msra.mxu1 %v307_v39  ;;  %278 = vmatprep.subr.bf16.mxu0 %v277_v40  ;;  %v84_v60 = vld [vmem:[#allocation5 + $0x168] sm:$0xff]  ;;  %v82_v61 = vld [vmem:[#allocation5 + $0x158] sm:$0xff]  ;;  %v283_v63 = vpack.c.bf16 %v75_v55, %v71_v54  ;;  %v315_v0 = vpack.c.bf16 %v77_v58, %v73_v56  ;;  %v79_v2 = vld [vmem:[#allocation5 + $0x140] sm:$0xff] }
  0x35   :  { %310 = vmatprep.subr.bf16.mxu1 %v309_v44  ;;  %v86_v62 = vld [vmem:[#allocation5 + $0x178] sm:$0xff]  ;;  %v285_v1 = vpack.c.bf16 %v84_v60, %v80_v59  ;;  %v83_v3 = vld [vmem:[#allocation5 + $0x160] sm:$0xff]  ;;  %v81_v4 = vld [vmem:[#allocation5 + $0x150] sm:$0xff] }
  0x36   :  { %v317_v5 = vpack.c.bf16 %v86_v62, %v82_v61  ;;  %v85_v6 = vld [vmem:[#allocation5 + $0x170] sm:$0xff]  ;;  %v88_v7 = vld [vmem:[#allocation5 + $0x188] sm:$0xff]  ;;  %v90_v9 = vld [vmem:[#allocation5 + $0x198] sm:$0xff]  ;;  %v287_v11 = vpack.c.bf16 %v83_v3, %v79_v2 }
  0x37   :  { %280 = vmatpush1.bf16.msra.mxu0 %v279_v51  ;;  %v92_v8 = vld [vmem:[#allocation5 + $0x1a8] sm:$0xff]  ;;  %v94_v10 = vld [vmem:[#allocation5 + $0x1b8] sm:$0xff]  ;;  %v319_v12 = vpack.c.bf16 %v85_v6, %v81_v4  ;;  %v87_v14 = vld [vmem:[#allocation5 + $0x180] sm:$0xff] }
  0x38   :  { %312 = vmatpush1.bf16.msra.mxu1 %v311_v52  ;;  %282 = vmatprep.subr.bf16.mxu0 %v281_v53  ;;  %v289_v13 = vpack.c.bf16 %v92_v8, %v88_v7  ;;  %v91_v15 = vld [vmem:[#allocation5 + $0x1a0] sm:$0xff]  ;;  %v89_v16 = vld [vmem:[#allocation5 + $0x190] sm:$0xff]  ;;  %v321_v17 = vpack.c.bf16 %v94_v10, %v90_v9  ;;  %v96_v19 = vld [vmem:[#allocation5 + $0x1c8] sm:$0xff] }
  0x39   :  { %314 = vmatprep.subr.bf16.mxu1 %v313_v57  ;;  %v93_v18 = vld [vmem:[#allocation5 + $0x1b0] sm:$0xff]  ;;  %v100_v20 = vld [vmem:[#allocation5 + $0x1e8] sm:$0xff]  ;;  %v98_v21 = vld [vmem:[#allocation5 + $0x1d8] sm:$0xff]  ;;  %v291_v23 = vpack.c.bf16 %v91_v15, %v87_v14 }
  0x3a   :  { %v102_v22 = vld [vmem:[#allocation5 + $0x1f8] sm:$0xff]  ;;  %v323_v24 = vpack.c.bf16 %v93_v18, %v89_v16  ;;  %v293_v25 = vpack.c.bf16 %v100_v20, %v96_v19  ;;  %v95_v26 = vld [vmem:[#allocation5 + $0x1c0] sm:$0xff]  ;;  %v97_v29 = vld [vmem:[#allocation5 + $0x1d0] sm:$0xff] }
  0x3b   :  { %284 = vmatpush1.bf16.msra.mxu0 %v283_v63  ;;  %v99_v27 = vld [vmem:[#allocation5 + $0x1e0] sm:$0xff]  ;;  %v325_v28 = vpack.c.bf16 %v102_v22, %v98_v21  ;;  %v101_v30 = vld [vmem:[#allocation5 + $0x1f0] sm:$0xff]  ;;  %v38_v33 = vld [vmem:[#allocation2] sm:$0xff] }
  0x3c   :  { %316 = vmatpush1.bf16.msra.mxu1 %v315_v0  ;;  %286 = vmatprep.subr.bf16.mxu0 %v285_v1  ;;  %v295_v31 = vpack.c.bf16 %v99_v27, %v95_v26  ;;  %v327_v32 = vpack.c.bf16 %v101_v30, %v97_v29 }
  0x3d   :  { %318 = vmatprep.subr.bf16.mxu1 %v317_v5 }
  0x3f   :  { %288 = vmatpush1.bf16.msra.mxu0 %v287_v11 }
  0x40   :  { %320 = vmatpush1.bf16.msra.mxu1 %v319_v12  ;;  %290 = vmatprep.subr.bf16.mxu0 %v289_v13 }
  0x41   :  { %322 = vmatprep.subr.bf16.mxu1 %v321_v17 }
  0x43   :  { %292 = vmatpush1.bf16.msra.mxu0 %v291_v23 }
  0x44   :  { %324 = vmatpush1.bf16.msra.mxu1 %v323_v24  ;;  %294 = vmatprep.subr.bf16.mxu0 %v293_v25 }
  0x45   :  { %326 = vmatprep.subr.bf16.mxu1 %v325_v28 }
  0x47   :  { %296 = vmatpush1.bf16.msra.mxu0 %v295_v31 }
  0x48   :  { %328 = vmatpush1.bf16.msra.mxu1 %v327_v32 }
  0x4a   :  { %168 = vmatmul.mubr.f32.vlgmr.msra.gmra.mrb[0].mxu0 %v38_v33 }
  0x4b   :  { %239 = vmatmul.mubr.f32.vlgmr.msra.gmra.mrb[0].mxu1 %v38_v33 }
 0x11d   :  { %v169_v34 = vpop.f32.mrb[0].mxu0 }
 0x11e   :  { %245 = vst [vmem:[#allocation7] sm:$0xff] %v169_v34  ;;  %v240_v35 = vpop.f32.mrb[0].mxu1  ;;  %v171_v36 = vpop.f32.mrb[1].mxu0 }
 0x11f   :  { %247 = vst [vmem:[#allocation7 + $0x10] sm:$0xff] %v240_v35  ;;  %246 = vst [vmem:[#allocation7 + $0x8] sm:$0xff] %v171_v36  ;;  %v242_v37 = vpop.f32.mrb[1].mxu1 }
 0x120   :  { %248 = vst [vmem:[#allocation7 + $0x18] sm:$0xff] %v242_v37 }
 0x121   :  { %390 = shalt.err (!%p387_p6)
}
 0x122   :  { %s391_s10 = scalar_lea.hbm %s473_s2, 512 }
 0x123   :  { %p392_p7 = scmp.ne.s32.totalorder %s473_s2, %s391_s10  ;;  %p395_p8 = scmp.lt.u32.totalorder %s391_s10, %s473_s2 }
 0x125   :  { %p397_p9 = pnand %p395_p8, %p392_p7 }
 0x127   :  { %400 = shalt.err (!%p397_p9)
}
 0x128   :  { %258 = dma.vmem_to_hbm [thread:$0]  %s256_s6, 512, %s473_s2, [#allocation4]  }
 0x129   :  { %405 = dma.done.wait [#allocation4], 512  }
 0x12a   :  { %406 = vsyncadd [#allocation4], 4294966784 }
 0x12b   :  { %262 = vsyncpa [#allocation3], 1 }
 0x12c   :  { %263 = vsyncpa [#allocation6], 1 }
 0x12d   :  { %264 = vsyncpa [#allocation4], 1 }

</bundles_post_ra>
